<compile_context>
chip_gen: v7x
topology: tpu7x:2x2x1
jax: 0.10.0
libtpu: 0.0.40
codegen_flags: <defaults>
</compile_context>

<pallas_src>
import functools

import jax
import jax.numpy as jnp
from jax.experimental import pallas as pl
from jax.experimental.pallas import tpu as pltpu


_SMALL_INPUT_BYTES = 1 << 20   # below this, a fused-XLA reduction wins.


def _dice_loss_jnp(output, target, eps):
    b = output.shape[0]
    o = output.reshape(b, -1).astype(jnp.float32)
    t = target.reshape(b, -1).astype(jnp.float32)
    inter = jnp.sum(o * t, axis=1)
    union = jnp.sum(o, axis=1) + jnp.sum(t, axis=1)
    dice = (2.0 * inter + eps) / (union + eps)
    return -jnp.mean(jnp.log(dice))


def _dice_partial_kernel(out_ref, tgt_ref, inter_ref, union_ref, *,
                         rows, tile_rows, tiles_per_split, needs_mask):
    """Accumulate per-(split, batch) lane-wise sum(o*t) and sum(o)+sum(t)."""
    s = pl.program_id(0)
    r = pl.program_id(2)

    @pl.when(r == 0)
    def _():
        inter_ref[...] = jnp.zeros_like(inter_ref)
        union_ref[...] = jnp.zeros_like(union_ref)

    o = out_ref[...].astype(jnp.float32)   # (tile_rows, lane)
    t = tgt_ref[...].astype(jnp.float32)   # (tile_rows, lane)

    def accumulate(o_v, t_v):
        inter_ref[...] += jnp.sum(o_v * t_v, axis=0, keepdims=True)
        union_ref[...] += jnp.sum(o_v + t_v, axis=0, keepdims=True)

    if needs_mask:
        # Only edge tiles (the ragged last row tile, or clamped overrun tiles
        # of an uneven core split) pay for the mask; full tiles take the
        # unmasked fast path.
        g = s * tiles_per_split + r                     # global row-tile index
        is_edge = (g + 1) * tile_rows > rows

        @pl.when(jnp.logical_not(is_edge))
        def _():
            accumulate(o, t)

        @pl.when(is_edge)
        def _():
            # Mask BEFORE the multiply/add so garbage (incl. NaN) in rows past
            # the true extent can never leak into the sums.
            row_ids = (jax.lax.broadcasted_iota(jnp.int32, o.shape, 0)
                       + g * tile_rows)
            valid = row_ids < rows
            accumulate(jnp.where(valid, o, 0.0), jnp.where(valid, t, 0.0))
    else:
        accumulate(o, t)


def dice_loss(output, target, eps=1.0, *, use_pallas=None, tile_bytes=None):
    """Pallas implementation of DiceLoss.forward. Returns a scalar float32."""
    assert output.shape == target.shape
    b = output.shape[0]
    itemsize = jnp.dtype(output.dtype).itemsize
    total_bytes = output.size * itemsize

    if use_pallas is None:
        use_pallas = total_bytes >= _SMALL_INPUT_BYTES
    if not use_pallas:
        # Tiny inputs: fixed pallas_call/grid-step overhead dominates; let XLA
        # fuse the whole reduction instead.
        return _dice_loss_jnp(output, target, eps)

    out2d = output.reshape(b, -1)
    tgt2d = target.reshape(b, -1)
    n = out2d.shape[1]

    # Lane width: largest multiple of 128 that divides N and (preferably)
    # leaves at least 8 rows, so the (rows, lane) view is sublane-dense.
    divisors = [c for c in (2048, 1024, 512, 256, 128) if n % c == 0]
    good = [c for c in divisors if n // c >= 8]
    if good:
        lane = good[0]
    elif divisors:
        lane = divisors[0]
    else:
        # TODO(synk): rare ragged-N (not a multiple of 128) path still
        # zero-pads (one extra HBM copy); an in-kernel lane-masked 2-D block
        # path would avoid it. Sum-safe as written.
        lane = 128
        pad = (-n) % lane
        out2d = jnp.pad(out2d, ((0, 0), (0, pad)))
        tgt2d = jnp.pad(tgt2d, ((0, 0), (0, pad)))
        n = n + pad

    rows = n // lane
    out3d = out2d.reshape(b, rows, lane)
    tgt3d = tgt2d.reshape(b, rows, lane)

    # ---- Generation-aware tile sizing & VMEM budget ------------------------
    try:
        vmem_cap = int(pltpu.get_tpu_info().vmem_capacity_bytes)
    except Exception:                       # interpret mode / unknown chip
        vmem_cap = 64 * 1024 * 1024         # v7x-safe conservative default
    f32_blowup = max(1, 4 // itemsize)      # in-kernel temporaries are f32
    if tile_bytes is None:
        # Per step: 2 operands x 2 pipeline buffers of the input tile plus
        # ~3 f32-sized temporaries. Keep that under ~70% of physical VMEM and
        # never above ~48 MiB (v7x only has 64 MiB). Default 2-deep buffering.
        budget = min(int(vmem_cap * 0.7), 48 << 20)
        tile_bytes = max(512 << 10, budget // (4 + 3 * f32_blowup))
    vmem_limit = min(int(vmem_cap * 0.9),
                     max(32 << 20,
                         (4 + 3 * f32_blowup) * tile_bytes + (8 << 20)))

    # Sublane packing multiple: 8 for 4-byte, 16 for bf16, 32 for int8/fp8.
    sub_mult = max(8, 32 // itemsize)
    target_rows = max(1, tile_bytes // (itemsize * lane))
    if target_rows >= rows:
        tile_rows = rows                                 # one tile per batch
    else:
        tile_rows = min(rows, max(sub_mult,
                                  (target_rows // sub_mult) * sub_mult))
    n_row_tiles = pl.cdiv(rows, tile_rows)

    # v7x has two TensorCores: with a single example, split the row sweep over
    # a leading "parallel" axis so both cores stream half the data. (On 1-TC
    # chips this is just a benign extra grid axis.)
    n_splits = 2 if (b == 1 and n_row_tiles >= 2) else 1
    tiles_per_split = pl.cdiv(n_row_tiles, n_splits)
    needs_mask = (rows % tile_rows != 0) or (n_splits * tiles_per_split != n_row_tiles)

    kernel = functools.partial(
        _dice_partial_kernel, rows=rows, tile_rows=tile_rows,
        tiles_per_split=tiles_per_split, needs_mask=needs_mask)

    def in_map(s, bi, ri):
        # Clamp overrun tiles of an uneven split back in range; their
        # contribution is fully masked out inside the kernel.
        g = jnp.minimum(s * tiles_per_split + ri, n_row_tiles - 1)
        return (bi, g, 0)

    in_spec = pl.BlockSpec((None, tile_rows, lane), in_map)
    part_shape = jax.ShapeDtypeStruct((n_splits * b, 1, lane), jnp.float32)
    part_spec = pl.BlockSpec((None, 1, lane),
                             lambda s, bi, ri: (s * b + bi, 0, 0))

    cost = pl.CostEstimate(
        flops=3 * b * n,
        transcendentals=0,
        bytes_accessed=2 * b * n * itemsize + 2 * n_splits * b * lane * 4)

    inter_p, union_p = pl.pallas_call(
        kernel,
        out_shape=(part_shape, part_shape),
        grid_spec=pltpu.PrefetchScalarGridSpec(
            num_scalar_prefetch=0,
            grid=(n_splits, b, tiles_per_split),
            in_specs=[in_spec, in_spec],
            out_specs=[part_spec, part_spec],
        ),
        compiler_params=pltpu.CompilerParams(
            dimension_semantics=("parallel", "parallel", "arbitrary"),
            vmem_limit_bytes=vmem_limit,
        ),
        cost_estimate=cost,
    )(out3d, tgt3d)

    # Tiny finalize in plain JAX on the lane-wide partial sums.
    inter = inter_p.reshape(n_splits, b, lane).sum(axis=(0, 2))   # sum(o * t)
    union = union_p.reshape(n_splits, b, lane).sum(axis=(0, 2))   # sum(o)+sum(t)
    dice = (2.0 * inter + eps) / (union + eps)
    return -jnp.mean(jnp.log(dice))


def dice_loss_ref(output, target, eps=1.0):
    return _dice_loss_jnp(output, target, eps)


if __name__ == "__main__":
    key = jax.random.PRNGKey(0)
    k1, k2, k3, k4, k5, k6 = jax.random.split(key, 6)

    # Case 1: NCHW probs/mask, batch=2 — run the Pallas kernel directly.
    out1 = jax.random.uniform(k1, (2, 4, 16, 16), dtype=jnp.float32)
    tgt1 = (jax.random.uniform(k2, (2, 4, 16, 16)) > 0.5).astype(jnp.float32)
    got1 = jax.block_until_ready(dice_loss(out1, tgt1, eps=1.0, use_pallas=True))
    want1 = jax.block_until_ready(dice_loss_ref(out1, tgt1, eps=1.0))
    assert jnp.allclose(got1, want1, rtol=1e-5, atol=1e-6), (got1, want1)

    # Auto path for the same tiny input takes the fused-XLA fast path.
    got1_auto = jax.block_until_ready(dice_loss(out1, tgt1, eps=1.0))
    assert jnp.allclose(got1_auto, want1, rtol=1e-5, atol=1e-6), (got1_auto, want1)

    # Case 2: batch=1 with a forced small tile — exercises the two-core row
    # split, the clamped overrun tile and the gated ragged-row masking.
    out2 = jax.random.uniform(k3, (1, 10, 64, 64), dtype=jnp.float32)
    tgt2 = (jax.random.uniform(k4, (1, 10, 64, 64)) > 0.5).astype(jnp.float32)
    got2 = jax.block_until_ready(
        dice_loss(out2, tgt2, eps=1.0, use_pallas=True, tile_bytes=64 << 10))
    want2 = jax.block_until_ready(dice_loss_ref(out2, tgt2, eps=1.0))
    assert jnp.allclose(got2, want2, rtol=1e-5, atol=1e-5), (got2, want2)

    # Case 3: bf16 inputs stream in their narrow dtype (cast to f32 in-kernel).
    out3 = jax.random.uniform(k5, (2, 3, 32, 96), dtype=jnp.float32).astype(jnp.bfloat16)
    tgt3 = (jax.random.uniform(k6, (2, 3, 32, 96)) > 0.5).astype(jnp.bfloat16)
    got3 = jax.block_until_ready(dice_loss(out3, tgt3, eps=1.0, use_pallas=True))
    want3 = jax.block_until_ready(dice_loss_ref(out3, tgt3, eps=1.0))
    assert jnp.allclose(got3, want3, rtol=1e-4, atol=1e-4), (got3, want3)

    print("KERNEL_OK")
</pallas_src>

<mosaic_0001>
module attributes {stable_mosaic.version = 11 : i64} {
  func.func @_dice_partial_kernel(%arg0: i32, %arg1: i32, %arg2: i32, %arg3: memref<1x8x128xf32, #tpu.memory_space<vmem>>, %arg4: memref<1x8x128xf32, #tpu.memory_space<vmem>>, %arg5: memref<1x1x128xf32, #tpu.memory_space<vmem>>, %arg6: memref<1x1x128xf32, #tpu.memory_space<vmem>>) attributes {dimension_semantics = [#tpu.dimension_semantics<parallel>, #tpu.dimension_semantics<parallel>, #tpu.dimension_semantics<arbitrary>], iteration_bounds = array<i64: 1, 2, 1>, scalar_prefetch = 0 : i64, scratch_operands = 0 : i64, tpu.core_type = #tpu.core_type<tc>, window_params = [{transform_indices = @transform_0, window_bounds = array<i64: 1, 8, 128>}, {transform_indices = @transform_1, window_bounds = array<i64: 1, 8, 128>}, {transform_indices = @transform_2, window_bounds = array<i64: 1, 1, 128>}, {transform_indices = @transform_3, window_bounds = array<i64: 1, 1, 128>}]} {
    %c0_i32 = arith.constant 0 : i32
    %0 = arith.cmpi eq, %arg2, %c0_i32 : i32
    %1 = arith.extui %0 : i1 to i32
    %c0_i32_0 = arith.constant 0 : i32
    %2 = arith.cmpi ne, %1, %c0_i32_0 : i32
    scf.if %2 {
      %cst_19 = arith.constant 0.000000e+00 : f32
      %25 = vector.broadcast %cst_19 : f32 to vector<1x128xf32>
      %c0_20 = arith.constant 0 : index
      %c0_21 = arith.constant 0 : index
      %c0_22 = arith.constant 0 : index
      %26 = vector.load %arg5[%c0_20, %c0_21, %c0_22] : memref<1x1x128xf32, #tpu.memory_space<vmem>>, vector<1x1x128xf32>
      %27 = vector.shape_cast %26 : vector<1x1x128xf32> to vector<1x128xf32>
      %28 = vector.shape_cast %25 : vector<1x128xf32> to vector<1x1x128xf32>
      tpu.vector_store %arg5[%c0_20, %c0_21, %c0_22], %28 {strides = array<i32>} : memref<1x1x128xf32, #tpu.memory_space<vmem>>, vector<1x1x128xf32>,
      %cst_23 = arith.constant 0.000000e+00 : f32
      %29 = vector.broadcast %cst_23 : f32 to vector<1x128xf32>
      %c0_24 = arith.constant 0 : index
      %c0_25 = arith.constant 0 : index
      %c0_26 = arith.constant 0 : index
      %30 = vector.load %arg6[%c0_24, %c0_25, %c0_26] : memref<1x1x128xf32, #tpu.memory_space<vmem>>, vector<1x1x128xf32>
      %31 = vector.shape_cast %30 : vector<1x1x128xf32> to vector<1x128xf32>
      %32 = vector.shape_cast %29 : vector<1x128xf32> to vector<1x1x128xf32>
      tpu.vector_store %arg6[%c0_24, %c0_25, %c0_26], %32 {strides = array<i32>} : memref<1x1x128xf32, #tpu.memory_space<vmem>>, vector<1x1x128xf32>,
    } else {
    }
    %c0 = arith.constant 0 : index
    %c0_1 = arith.constant 0 : index
    %c0_2 = arith.constant 0 : index
    %3 = vector.load %arg3[%c0, %c0_1, %c0_2] : memref<1x8x128xf32, #tpu.memory_space<vmem>>, vector<1x8x128xf32>
    %4 = vector.shape_cast %3 : vector<1x8x128xf32> to vector<8x128xf32>
    %c0_3 = arith.constant 0 : index
    %c0_4 = arith.constant 0 : index
    %c0_5 = arith.constant 0 : index
    %5 = vector.load %arg4[%c0_3, %c0_4, %c0_5] : memref<1x8x128xf32, #tpu.memory_space<vmem>>, vector<1x8x128xf32>
    %6 = vector.shape_cast %5 : vector<1x8x128xf32> to vector<8x128xf32>
    %c0_6 = arith.constant 0 : index
    %c0_7 = arith.constant 0 : index
    %c0_8 = arith.constant 0 : index
    %7 = vector.load %arg5[%c0_6, %c0_7, %c0_8] : memref<1x1x128xf32, #tpu.memory_space<vmem>>, vector<1x1x128xf32>
    %8 = vector.shape_cast %7 : vector<1x1x128xf32> to vector<1x128xf32>
    %9 = arith.mulf %4, %6 : vector<8x128xf32>
    %cst = arith.constant dense<0.000000e+00> : vector<128xf32>
    %10 = vector.multi_reduction <add>, %9, %cst [0] : vector<8x128xf32> to vector<128xf32>
    %11 = vector.shape_cast %10 : vector<128xf32> to vector<1x128xf32>
    %12 = arith.addf %8, %11 : vector<1x128xf32>
    %c0_9 = arith.constant 0 : index
    %c0_10 = arith.constant 0 : index
    %c0_11 = arith.constant 0 : index
    %13 = vector.load %arg5[%c0_9, %c0_10, %c0_11] : memref<1x1x128xf32, #tpu.memory_space<vmem>>, vector<1x1x128xf32>
    %14 = vector.shape_cast %13 : vector<1x1x128xf32> to vector<1x128xf32>
    %15 = vector.shape_cast %12 : vector<1x128xf32> to vector<1x1x128xf32>
    tpu.vector_store %arg5[%c0_9, %c0_10, %c0_11], %15 {strides = array<i32>} : memref<1x1x128xf32, #tpu.memory_space<vmem>>, vector<1x1x128xf32>,
    %c0_12 = arith.constant 0 : index
    %c0_13 = arith.constant 0 : index
    %c0_14 = arith.constant 0 : index
    %16 = vector.load %arg6[%c0_12, %c0_13, %c0_14] : memref<1x1x128xf32, #tpu.memory_space<vmem>>, vector<1x1x128xf32>
    %17 = vector.shape_cast %16 : vector<1x1x128xf32> to vector<1x128xf32>
    %18 = arith.addf %4, %6 : vector<8x128xf32>
    %cst_15 = arith.constant dense<0.000000e+00> : vector<128xf32>
    %19 = vector.multi_reduction <add>, %18, %cst_15 [0] : vector<8x128xf32> to vector<128xf32>
    %20 = vector.shape_cast %19 : vector<128xf32> to vector<1x128xf32>
    %21 = arith.addf %17, %20 : vector<1x128xf32>
    %c0_16 = arith.constant 0 : index
    %c0_17 = arith.constant 0 : index
    %c0_18 = arith.constant 0 : index
    %22 = vector.load %arg6[%c0_16, %c0_17, %c0_18] : memref<1x1x128xf32, #tpu.memory_space<vmem>>, vector<1x1x128xf32>
    %23 = vector.shape_cast %22 : vector<1x1x128xf32> to vector<1x128xf32>
    %24 = vector.shape_cast %21 : vector<1x128xf32> to vector<1x1x128xf32>
    tpu.vector_store %arg6[%c0_16, %c0_17, %c0_18], %24 {strides = array<i32>} : memref<1x1x128xf32, #tpu.memory_space<vmem>>, vector<1x1x128xf32>,
    return
  }
  func.func @transform_0(%arg0: i32, %arg1: i32, %arg2: i32) -> (i32, i32, i32) {
    %c1_i32 = arith.constant 1 : i32
    %0 = arith.muli %arg0, %c1_i32 : i32
    %1 = arith.addi %0, %arg2 : i32
    %c0_i32 = arith.constant 0 : i32
    %2 = arith.minsi %1, %c0_i32 : i32
    %c0_i32_0 = arith.constant 0 : i32
    %c0_i32_1 = arith.constant 0 : i32
    return %arg1, %2, %c0_i32_0 : i32, i32, i32
  }
  func.func @transform_1(%arg0: i32, %arg1: i32, %arg2: i32) -> (i32, i32, i32) {
    %c1_i32 = arith.constant 1 : i32
    %0 = arith.muli %arg0, %c1_i32 : i32
    %1 = arith.addi %0, %arg2 : i32
    %c0_i32 = arith.constant 0 : i32
    %2 = arith.minsi %1, %c0_i32 : i32
    %c0_i32_0 = arith.constant 0 : i32
    %c0_i32_1 = arith.constant 0 : i32
    return %arg1, %2, %c0_i32_0 : i32, i32, i32
  }
  func.func @transform_2(%arg0: i32, %arg1: i32, %arg2: i32) -> (i32, i32, i32) {
    %c2_i32 = arith.constant 2 : i32
    %0 = arith.muli %arg0, %c2_i32 : i32
    %1 = arith.addi %0, %arg1 : i32
    %c0_i32 = arith.constant 0 : i32
    %c0_i32_0 = arith.constant 0 : i32
    %c0_i32_1 = arith.constant 0 : i32
    return %1, %c0_i32, %c0_i32_0 : i32, i32, i32
  }
  func.func @transform_3(%arg0: i32, %arg1: i32, %arg2: i32) -> (i32, i32, i32) {
    %c2_i32 = arith.constant 2 : i32
    %0 = arith.muli %arg0, %c2_i32 : i32
    %1 = arith.addi %0, %arg1 : i32
    %c0_i32 = arith.constant 0 : i32
    %c0_i32_0 = arith.constant 0 : i32
    %c0_i32_1 = arith.constant 0 : i32
    return %1, %c0_i32, %c0_i32_0 : i32, i32, i32
  }
}

</mosaic_0001>

<bundles_post_ra>
// kernel: tpu_custom_call.1
= control target key start
LH: loop header
LB: loop body
LE: loop exit
PB: predicated region body
PF: predicated region fallthrough
CT: control target
= control target key end

     0   :  { %9 = vsyncpa [#allocation3], 0  ;;  %s1045_s0 = inlined_call_operand.hbm [shape: f32[2,8,128], index: 0, kind: input, shape index: {}]   ;;  %s1046_s1 = inlined_call_operand.hbm [shape: f32[2,8,128], index: 1, kind: input, shape index: {}]   ;;  %s1047_s2 = inlined_call_operand.hbm [shape: f32[2,1,128], index: 2, kind: output, shape index: {0}]   ;;  %s1048_s3 = inlined_call_operand.hbm [shape: f32[2,1,128], index: 3, kind: output, shape index: {1}]  }
   0x1   :  { %11 = vsyncpa [#allocation3 + $0x1], 0 }
   0x2   :  { %12 = vsyncpa [#allocation6], 0 }
   0x3   :  { %14 = vsyncpa [#allocation6 + $0x1], 0 }
   0x4   :  { %15 = vsyncpa [#allocation4], 0 }
   0x5   :  { %17 = vsyncpa [#allocation4 + $0x1], 0 }
   0x6   :  { %18 = vsyncpa [#allocation9], 0 }
   0x7   :  { %20 = vsyncpa [#allocation9 + $0x1], 0  ;;  %s782_s12 = smov 0   ;;  %s784_s13 = smov 0  }
   0x8   :  { %s786_s14 = smov 0   ;;  %s788_s15 = smov 0  }
   0x9   :  { %s790_s16 = smov 0   ;;  %s792_s17 = smov 0  }
   0xa LB: > { %s489_s18 = sadd.s32 4294967295, %s755_s17   ;;  %s490_s19 = sadd.s32 4294967294, %s755_s17   ;;  %s755_s17 = sphi %s792_s17, %s26_s17   ;;  %s751_s16 = sphi %s790_s16, %s1068_s16   ;;  %s747_s15 = sphi %s788_s15, %s1067_s15   ;;  %s743_s14 = sphi %s786_s14, %s1066_s14   ;;  %s739_s13 = sphi %s784_s13, %s1065_s13   ;;  %s735_s12 = sphi %s782_s12, %s1064_s12  }
   0xb   : > { %s41_s20 = sadd.s32 1, %s751_s16  ;;  %s60_s21 = sadd.s32 1, %s743_s14 }
   0xc   : > { %p43_p0 = scmp.ge.s32.totalorder %s41_s20, 2  ;;  %p67_p1 = scmp.ne.s32.totalorder %s743_s14, %s739_s13 }
   0xd   : > { %p68_p2 = scmp.eq.s32.totalorder %s755_s17, 0  ;;  %p73_p3 = scmp.ne.s32.totalorder %s739_s13, %s735_s12 }
   0xe   : > { %s1070_s20 = smov (%p43_p0, %s41_s20), 0  ;;  %p74_p5 = scmp.eq.s32.totalorder %s489_s18, 0 }
   0xf   : > { %p823_p4 = por %p68_p2, %p67_p1  ;;  %s55_s23 = ssub.s32 %s751_s16, %s1070_s20 }
  0x10   : > { %p135_p6 = scmp.eq.s32.totalorder %s489_s18, 1  ;;  %p58_p7 = scmp.eq.s32.totalorder %s55_s23, 0 }
  0x11   : > { %p829_p8 = por %p74_p5, %p73_p3  ;;  %p141_p10 = scmp.eq.s32.totalorder %s490_s19, 1 }
  0x12   : > { %p833_p9 = por %p135_p6, %p67_p1  ;;  %p526_p13 = scmp.lt.s32.totalorder %s755_s17, 2 }
  0x13   : > { %s1052_s24 = scalar_select %p829_p8, 1, 0 }
  0x14   : > { %s1053_s25 = scalar_select %p833_p9, 1, 0 }
  0x15   : > { %s838_s26 = scalar_select %p58_p7, %s743_s14, %s60_s21  }
  0x16   : > { %p840_p11 = por %p141_p10, %p73_p3  ;;  %s847_s28 = sand.u32 1, %s743_s14  }
  0x17   : > { %s493_s29 = sshll.u32 %s847_s28, 3  ;;  %s494_s30 = sshll.u32 %s751_s16, 7 }
  0x18   : > { %s1054_s27 = scalar_select %p840_p11, 1, 0 }
  0x19   : > { %s856_s6 = scalar_lea.hbm %s1045_s0, %s494_s30  ;;  %s195_s7 = scalar_lea.vmem [#allocation2], %s493_s29 }
  0x1a   : > { %s206_s8 = sshll.u32 %s195_s7, 4  ;;  %p864_p0 = pnand %p526_p13, %p823_p4  ;;  %s860_s8 = int_to_ptr.vmem [resolvable:$true] %s206_s8 }
  0x1b   : > { %s192_s10 = scalar_lea.sflag [#allocation3], %s847_s28  ;;  %s577_s11 = scalar_lea.hbm %s856_s6, 128 }
  0x1c   : > { %p578_p3 = scmp.ne.s32.totalorder %s856_s6, %s577_s11  ;;  %p579_p5 = pneg %p864_p0 }
  0x1d   : > { %s582_s21 = scalar_lea.hbm %s1045_s0, 256  ;;  %p583_p4 = scmp.lt.u32.totalorder %s856_s6, %s1045_s0 }
  0x1e   : > { %p580_p6 = pnand %p579_p5, %p578_p3  ;;  %p584_p10 = scmp.lt.u32.totalorder %s582_s21, %s577_s11 }
  0x1f   : > { %p586_p12 = scmp.lt.u32.totalorder %s577_s11, %s856_s6 }
  0x20   : > { %p581_p7 = pneg %p580_p6  ;;  %p585_p13 = por %p584_p10, %p583_p4 }
  0x22   : > { %p587_p1 = por %p586_p12, %p585_p13 }
  0x24   : > { %p588_p2 = pnand %p587_p1, %p581_p7 }
  0x26   : > { %591 = shalt.err (!%p588_p2)
}
  0x27   : > { %s592_s4 = scalar_lea.vmem %s860_s8, 128  ;;  %s757_s5 = smov [#allocation2]  }
  0x28   : > { %p593_p3 = scmp.ne.s32.totalorder %s860_s8, %s592_s4  ;;  %s597_s7 = sshll.u32 %s757_s5, 4  ;;  %s598_s7 = int_to_ptr.vmem [resolvable:$false] %s597_s7 }
  0x29   : > { %s599_s18 = scalar_lea.vmem %s598_s7, 256  ;;  %p600_p9 = scmp.lt.s32.totalorder %s860_s8, %s598_s7 }
  0x2a   : > { %p595_p6 = pnand %p593_p3, %p579_p5  ;;  %p601_p4 = scmp.lt.s32.totalorder %s599_s18, %s592_s4 }
  0x2c   : > { %p596_p11 = pneg %p595_p6  ;;  %p602_p10 = por %p601_p4, %p600_p9 }
  0x2e   : > { %p603_p12 = pnand %p602_p10, %p596_p11 }
  0x30   : > { %606 = shalt.err (!%p603_p12)
}
  0x31   : > { %515 = dma.hbm_to_vmem [thread:$0]  (!%p864_p0), %s856_s6, 128, %s860_s8, %s192_s10  }
  0x32   : > { %p1056_p1 = scmp.lt.s32.totalorder %s755_s17, 3  ;;  %p1057_p2 = scmp.ge.s32.totalorder %s755_s17, 1 }
  0x33   : > { %s909_s22 = scalar_lea.hbm %s1046_s1, %s494_s30  ;;  %s217_s23 = scalar_lea.vmem [#allocation5], %s493_s29 }
  0x34   : > { %p900_p7 = pnand %p1057_p2, %p1056_p1  ;;  %s228_s4 = sshll.u32 %s217_s23, 4  ;;  %s229_s4 = int_to_ptr.vmem [resolvable:$true] %s228_s4 }
  0x35   : > { %s214_s6 = scalar_lea.sflag [#allocation6], %s847_s28  ;;  %s607_s8 = scalar_lea.hbm %s909_s22, 128 }
  0x36   : > { %s1058_s11 = scalar_select %p900_p7, 1, 0 }
  0x37   : > { %p608_p9 = scmp.ne.s32.totalorder %s909_s22, %s607_s8  ;;  %s612_s30 = scalar_lea.hbm %s1046_s1, 256 }
  0x38   : > { %p613_p3 = scmp.lt.u32.totalorder %s909_s22, %s1046_s1  ;;  %p614_p6 = scmp.lt.u32.totalorder %s612_s30, %s607_s8 }
  0x39   : > { %p610_p11 = pnand %p608_p9, %p579_p5  ;;  %p616_p10 = scmp.lt.u32.totalorder %s607_s8, %s909_s22 }
  0x3a   : > { %p615_p4 = por %p614_p6, %p613_p3 }
  0x3b   : > { %p611_p13 = pneg %p610_p11 }
  0x3c   : > { %p617_p12 = por %p616_p10, %p615_p4 }
  0x3e   : > { %p618_p1 = pnand %p617_p12, %p611_p13 }
  0x40   : > { %621 = shalt.err (!%p618_p1)
}
  0x41   : > { %s622_s28 = scalar_lea.vmem %s229_s4, 128  ;;  %s758_s29 = smov [#allocation5]  }
  0x42   : > { %p623_p2 = scmp.ne.s32.totalorder %s229_s4, %s622_s28  ;;  %s627_s19 = sshll.u32 %s758_s29, 4  ;;  %s628_s19 = int_to_ptr.vmem [resolvable:$false] %s627_s19 }
  0x43   : > { %s629_s21 = scalar_lea.vmem %s628_s19, 256  ;;  %p630_p8 = scmp.lt.s32.totalorder %s229_s4, %s628_s19 }
  0x44   : > { %p625_p9 = pnand %p623_p2, %p579_p5  ;;  %p631_p7 = scmp.lt.s32.totalorder %s629_s21, %s622_s28 }
  0x46   : > { %p626_p11 = pneg %p625_p9  ;;  %p632_p3 = por %p631_p7, %p630_p8 }
  0x48   : > { %p633_p6 = pnand %p632_p3, %p626_p11 }
  0x4a   : > { %636 = shalt.err (!%p633_p6)
}
  0x4b   : > { %518 = dma.hbm_to_vmem [thread:$0]  (!%p864_p0), %s909_s22, 128, %s229_s4, %s214_s6  }
  0x4c   : > { %p1059_p13 = scmp.ne.s32.totalorder %s1058_s11, 0 }
  0x4d   : > { %s936_s23 = sand.u32 (!%p1059_p13), 1, %s739_s13   ;;  %p1060_p5 = scmp.ne.s32.totalorder (!%p1059_p13), %s1052_s24, 0 }
  0x4e   : > { %237 = sbr.rel (%p1059_p13) target bundleno = 142 (0x8e), region = 28  ;;  %s498_s8 = sshll.u32 (!%p1059_p13), %s936_s23, 3 }
  0x4f   : > { %s240_s10 = scalar_lea.sflag (!%p1059_p13), [#allocation3], %s936_s23  ;;  %s243_s5 = scalar_lea.vmem (!%p1059_p13), [#allocation2], %s498_s8 }
  0x55   : > { %718 = dma.done.wait (%p1060_p5), %s240_s10, 128  }
  0x56   : > { %720 = vsyncadd (%p1060_p5), %s240_s10, 4294967168  ;;  %s249_s9 = scalar_lea.sflag [#allocation6], %s936_s23  ;;  %s252_s22 = scalar_lea.vmem [#allocation5], %s498_s8 }
  0x57   : > { %722 = dma.done.wait (%p1060_p5), %s249_s9, 128  }
  0x58   : > { %724 = vsyncadd (%p1060_p5), %s249_s9, 4294967168  ;;  %s950_s11 = scalar_lea.vmem [#allocation7], %s936_s23  ;;  %v759_v0 = vmov 0.0   ;;  %s954_s4 = scalar_lea.vmem [#allocation8], %s936_s23  ;;  %v299_v1 = vld [vmem:[%s243_s5] sm:$0xff]  ;;  %v300_v2 = vld [vmem:[%s252_s22] sm:$0xff] }
  0x59   : > { %297 = vst [vmem:[%s950_s11] sm:$0x1] %v759_v0  ;;  %298 = vst [vmem:[%s954_s4] sm:$0x1] %v759_v0  ;;  %v302_v3 = vmul.f32 %v300_v2, %v299_v1  ;;  %v312_v4 = vadd.f32 %v300_v2, %v299_v1  ;;  %s500_s24 = sshll.u32 %s747_s15, 4  ;;  %s340_s6 = sshll.u32 %s950_s11, 4  ;;  %s967_s6 = int_to_ptr.vmem [resolvable:$true] %s340_s6 }
  0x5a   : > { %s355_s30 = sshll.u32 %s954_s4, 4  ;;  %s965_s28 = scalar_lea.hbm %s1047_s2, %s500_s24  ;;  %s974_s30 = int_to_ptr.vmem [resolvable:$true] %s355_s30 }
  0x5b   : > { %v303_v5 = vrot.slane %v302_v3, 4  ;;  %v313_v6 = vrot.slane %v312_v4, 4  ;;  %s972_s15 = scalar_lea.hbm %s1048_s3, %s500_s24  ;;  %s322_s21 = scalar_lea.sflag [#allocation4], %s936_s23 }
  0x5c   : > { %s637_s8 = scalar_lea.vmem %s967_s6, 16  ;;  %p1061_p0 = scmp.ne.s32.totalorder %s1053_s25, 0 }
  0x5d   : > { %v304_v7 = vadd.f32 %v303_v5, %v302_v3  ;;  %v314_v8 = vadd.f32 %v313_v6, %v312_v4  ;;  %p638_p8 = scmp.ne.s32.totalorder %s967_s6, %s637_s8  ;;  %s760_s10 = smov [#allocation7]  }
  0x5e   : > { %s641_s5 = sshll.u32 %s760_s10, 4  ;;  %s642_s5 = int_to_ptr.vmem [resolvable:$false] %s641_s5 }
  0x5f   : > { %v305_v9 = vrot.slane %v304_v7, 2  ;;  %v315_v10 = vrot.slane %v314_v8, 2  ;;  %p639_p7 = pnand %p638_p8, %p1061_p0  ;;  %s643_s9 = scalar_lea.vmem %s642_s5, 32 }
  0x60   : > { %v301_v15 = vld [vmem:[%s950_s11] sm:$0x1]  ;;  %p644_p10 = scmp.lt.s32.totalorder %s967_s6, %s642_s5  ;;  %p645_p12 = scmp.lt.s32.totalorder %s643_s9, %s637_s8 }
  0x61   : > { %v306_v11 = vadd.f32 %v305_v9, %v304_v7  ;;  %v316_v12 = vadd.f32 %v315_v10, %v314_v8  ;;  %v311_v16 = vld [vmem:[%s954_s4] sm:$0x1]  ;;  %p640_p4 = pneg %p639_p7 }
  0x62   : > { %p646_p1 = por %p645_p12, %p644_p10 }
  0x63   : > { %v307_v13 = vrot.slane %v306_v11, 1  ;;  %v317_v14 = vrot.slane %v316_v12, 1 }
  0x64   : > { %p647_p2 = pnand %p646_p1, %p640_p4 }
  0x65   : > { %v308_v17 = vadd.f32 %v307_v13, %v306_v11  ;;  %v318_v18 = vadd.f32 %v317_v14, %v316_v12 }
  0x67   : > { %v309_v19 = vadd.f32 %v308_v17, %v301_v15  ;;  %v319_v20 = vadd.f32 %v318_v18, %v311_v16 }
  0x69   : > { %310 = vst [vmem:[%s950_s11] sm:$0x1] %v309_v19  ;;  %320 = vst [vmem:[%s954_s4] sm:$0x1] %v319_v20 }
  0x6a   : > { %650 = shalt.err (!%p647_p2)
}
  0x6b   : > { %s651_s22 = scalar_lea.hbm %s965_s28, 16  ;;  %s655_s24 = scalar_lea.hbm %s1047_s2, 32 }
  0x6c   : > { %p652_p9 = scmp.ne.s32.totalorder %s965_s28, %s651_s22  ;;  %p656_p6 = scmp.lt.u32.totalorder %s965_s28, %s1047_s2 }
  0x6d   : > { %p657_p13 = scmp.lt.u32.totalorder %s655_s24, %s651_s22  ;;  %p659_p8 = scmp.lt.u32.totalorder %s651_s22, %s965_s28 }
  0x6e   : > { %p653_p11 = pnand %p652_p9, %p1061_p0 }
  0x6f   : > { %p658_p5 = por %p657_p13, %p656_p6 }
  0x70   : > { %p654_p3 = pneg %p653_p11 }
  0x71   : > { %p660_p7 = por %p659_p8, %p658_p5 }
  0x73   : > { %p661_p4 = pnand %p660_p7, %p654_p3 }
  0x75   : > { %664 = shalt.err (!%p661_p4)
}
  0x76   : > { %508 = dma.vmem_to_hbm [thread:$0]  (%p1061_p0), %s967_s6, 16, %s965_s28, %s322_s21  }
  0x77   : > { %s326_s29 = scalar_lea.sflag [#allocation9], %s936_s23  ;;  %s665_s19 = scalar_lea.vmem %s974_s30, 16 }
  0x78   : > { %p666_p10 = scmp.ne.s32.totalorder %s974_s30, %s665_s19  ;;  %s761_s8 = smov [#allocation8]  }
  0x79   : > { %s669_s10 = sshll.u32 %s761_s8, 4  ;;  %s670_s10 = int_to_ptr.vmem [resolvable:$false] %s669_s10 }
  0x7a   : > { %p667_p12 = pnand %p666_p10, %p1061_p0  ;;  %s671_s5 = scalar_lea.vmem %s670_s10, 32 }
  0x7b   : > { %p672_p2 = scmp.lt.s32.totalorder %s974_s30, %s670_s10  ;;  %p673_p9 = scmp.lt.s32.totalorder %s671_s5, %s665_s19 }
  0x7c   : > { %p668_p1 = pneg %p667_p12 }
  0x7d   : > { %p674_p11 = por %p673_p9, %p672_p2 }
  0x7f   : > { %p675_p3 = pnand %p674_p11, %p668_p1 }
  0x81   : > { %678 = shalt.err (!%p675_p3)
}
  0x82   : > { %s679_s23 = scalar_lea.hbm %s972_s15, 16  ;;  %s683_s21 = scalar_lea.hbm %s1048_s3, 32 }
  0x83   : > { %p680_p6 = scmp.ne.s32.totalorder %s972_s15, %s679_s23  ;;  %p684_p8 = scmp.lt.u32.totalorder %s972_s15, %s1048_s3 }
  0x84   : > { %p685_p7 = scmp.lt.u32.totalorder %s683_s21, %s679_s23  ;;  %p687_p10 = scmp.lt.u32.totalorder %s679_s23, %s972_s15 }
  0x85   : > { %p681_p13 = pnand %p680_p6, %p1061_p0 }
  0x86   : > { %p686_p4 = por %p685_p7, %p684_p8 }
  0x87   : > { %p682_p5 = pneg %p681_p13 }
  0x88   : > { %p688_p12 = por %p687_p10, %p686_p4 }
  0x8a   : > { %p689_p1 = pnand %p688_p12, %p682_p5 }
  0x8c   : > { %692 = shalt.err (!%p689_p1)
}
  0x8d   : > { %509 = dma.vmem_to_hbm [thread:$0]  (%p1061_p0), %s974_s30, 16, %s972_s15, %s326_s29  }
  0x8e PF: > { %s367_s11 = sand.u32 1, %s735_s12   ;;  %p1062_p2 = scmp.ne.s32.totalorder %s1054_s27, 0 }
  0x8f   : > { %p1063_p9 = scmp.ge.s32.totalorder %s755_s17, 2  ;;  %s368_s4 = scalar_lea.sflag [#allocation4], %s367_s11 }
  0x91   : > { %p520_p11 = pnand %p1063_p9, %p1062_p2 }
  0x93   : > { %726 = dma.done.wait (!%p520_p11), %s368_s4, 16  }
  0x94   : > { %728 = vsyncadd (!%p520_p11), %s368_s4, 4294967280  ;;  %s376_s24 = scalar_lea.sflag [#allocation9], %s367_s11 }
  0x95   : > { %730 = dma.done.wait (!%p520_p11), %s376_s24, 16  }
  0x96   : > { %732 = vsyncadd (!%p520_p11), %s376_s24, 4294967280  ;;  %s26_s17 = sadd.s32 1, %s755_s17   ;;  %s1064_s12 = smov %s739_s13 }
  0x97   : > { %p23_p3 = scmp.ge.s32.totalorder %s26_s17, 4   ;;  %s1065_s13 = smov %s743_s14 }
  0x98   : > { %s1066_s14 = smov %s838_s26  ;;  %s1067_s15 = smov %s751_s16 }
  0x99   : > { %s1068_s16 = smov %s1070_s20  ;;  %25 = sbr.rel (!%p23_p3) target bundleno = 10 (0xa), region = 107 }
  0xa0   :  { %380 = vsyncpa [#allocation3], 1 }
  0xa1   :  { %382 = vsyncpa [#allocation3 + $0x1], 1 }
  0xa2   :  { %383 = vsyncpa [#allocation6], 1 }
  0xa3   :  { %385 = vsyncpa [#allocation6 + $0x1], 1 }
  0xa4   :  { %386 = vsyncpa [#allocation4], 1 }
  0xa5   :  { %388 = vsyncpa [#allocation4 + $0x1], 1 }
  0xa6   :  { %389 = vsyncpa [#allocation9], 1 }
  0xa7   :  { %391 = vsyncpa [#allocation9 + $0x1], 1 }

</bundles_post_ra>
